<compile_context>
chip_gen: v6e
topology: v6e:2x2x1
jax: 0.10.0
libtpu: 0.0.40
codegen_flags: <defaults>
</compile_context>

<pallas_src>
import functools

import numpy as np
import jax
import jax.numpy as jnp
from jax.experimental import pallas as pl
from jax.experimental.pallas import tpu as pltpu


# ----------------------------------------------------------------------------
# hardware-aware limits / tiling helpers
# ----------------------------------------------------------------------------
@functools.lru_cache(maxsize=1)
def _vmem_limit_bytes():
    """Generation-aware scoped-VMEM limit: 3/4 of physical, capped at 112 MiB.
    (v5e/v6e: 96 MiB of 128; v7x: 48 MiB of 64.)"""
    try:
        cap = int(pltpu.get_tpu_info().vmem_capacity_bytes)
    except Exception:
        cap = 64 * 1024 * 1024
    return min((cap * 3) // 4, 112 * 1024 * 1024)


def _pick_h_tile(h, w, nc, budget_bytes):
    """Largest H-tile (multiple of 8, dividing H) whose kernel-1 working set
    (double-buffered streams + live per-coil temporaries) fits the budget."""
    cands = [d for d in range(8, h + 1, 8) if h % d == 0]
    if not cands:
        return h
    # per H-row: 2x double-buffered (cur 2 + sm 2*nc + out 2) f32 streams
    #            + ~5 live (nc, th, w) temporaries
    per_row = 4 * w * (2 * (4 + 2 * nc) + 5 * nc)
    fixed = 8 * w * w          # M_W (bf16, 2 planes, double-buffered) + slack
    for d in sorted(cands, reverse=True):
        if per_row * d + fixed <= budget_bytes:
            return d
    return cands[0]


def _pick_hw_tile(hwp, s, budget_bytes, target=32768):
    """Largest 128-multiple tile dividing hwp, bounded by target and VMEM
    budget (12 double-buffered (s, tile) f32 streams per step)."""
    cap = min(target, max(128, (budget_bytes // (96 * s)) // 128 * 128))
    if hwp <= cap:
        return hwp
    t = cap - (cap % 128)
    while t >= 128:
        if hwp % t == 0:
            return t
        t -= 128
    return 128


@functools.lru_cache(maxsize=None)
def _centered_dft_matrix(n):
    """F s.t. F @ x == fftshift(fft(ifftshift(x), norm='ortho'))."""
    eye = np.eye(n)
    return np.fft.fftshift(
        np.fft.fft(np.fft.ifftshift(eye, axes=0), axis=0, norm="ortho"), axes=0)


def _masked_w_operator(mask, w):
    """M_W = F_W^T diag(m) conj(F_W): fft2c -> column mask -> ifft2c collapsed
    to a single right-multiplication (row transforms cancel).  Built with an
    explicit conj(F) so it is correct for odd W as well."""
    f = jnp.asarray(_centered_dft_matrix(w), jnp.complex64)          # (W, W)
    m_vec = mask[:, 0, 0, :, 0].astype(jnp.float32)                   # (B, W)
    m_w = jnp.einsum("ku,bk,kv->buv", f, m_vec, jnp.conj(f))          # (B, W, W)
    return (jnp.real(m_w).astype(jnp.bfloat16),
            jnp.imag(m_w).astype(jnp.bfloat16))


def _complex_to_chan(x):
    # (B, C, H, W, 2) -> (B, 2C, H, W)   [real channels..., imag channels...]
    b, c, h, w, _ = x.shape
    return jnp.transpose(x, (0, 4, 1, 2, 3)).reshape(b, 2 * c, h, w)


def _chan_to_complex(x):
    # (B, 2C, H, W) -> (B, C, H, W, 2)
    b, c2, h, w = x.shape
    return jnp.transpose(x.reshape(b, 2, c2 // 2, h, w), (0, 2, 3, 4, 1))


# ----------------------------------------------------------------------------
# Kernel 1:  ffx = sens_reduce(where(mask, sens_expand(x, S), 0), S)
#   Column mask folded into one W x W complex operator M_W (per batch).
#   grid = (B, num_adj_slices, H // TH); all axes parallel.
# ----------------------------------------------------------------------------
def _ffx_kernel(cur_r_ref, cur_i_ref, sm_r_ref, sm_i_ref, mwr_ref, mwi_ref,
                out_r_ref, out_i_ref):
    xr = cur_r_ref[0, 0]              # (TH, W)
    xi = cur_i_ref[0, 0]
    sr = sm_r_ref[0]                  # (NC, TH, W): all coils of this slice
    si = sm_i_ref[0]
    nc, th, w = sr.shape

    # coil images  A = X * S  (image broadcast over coils)
    ar = xr[None] * sr - xi[None] * si
    ai = xr[None] * si + xi[None] * sr

    # masked fft2c -> ifft2c collapsed to U = A @ M_W.  Direct 2x2 complex
    # product in bf16 (no Karatsuba -> no cancellation from the bf16 cast).
    ar2 = ar.reshape(nc * th, w).astype(jnp.bfloat16)   # TH % 8 == 0: free merge
    ai2 = ai.reshape(nc * th, w).astype(jnp.bfloat16)
    mwr = mwr_ref[0]                  # (W, W) bf16
    mwi = mwi_ref[0]
    ur = (jnp.dot(ar2, mwr, preferred_element_type=jnp.float32)
          - jnp.dot(ai2, mwi, preferred_element_type=jnp.float32)).reshape(nc, th, w)
    ui = (jnp.dot(ar2, mwi, preferred_element_type=jnp.float32)
          + jnp.dot(ai2, mwr, preferred_element_type=jnp.float32)).reshape(nc, th, w)

    # sens_reduce: multiply by conj(S), sum over coils
    out_r_ref[0, 0] = jnp.sum(ur * sr + ui * si, axis=0)
    out_i_ref[0, 0] = jnp.sum(ui * sr - ur * si, axis=0)


def _ffx_pallas(cur_r, cur_i, sm_r, sm_i, mwr, mwi, h_tile, vmem_limit):
    B, S, H, W = cur_r.shape
    NC = sm_r.shape[1] // S

    img_spec = pl.BlockSpec((1, 1, h_tile, W), lambda b, s, h: (b, s, h, 0))
    sm_spec = pl.BlockSpec((1, NC, h_tile, W), lambda b, s, h: (b, s, h, 0))
    mw_spec = pl.BlockSpec((1, W, W), lambda b, s, h: (b, 0, 0))

    return pl.pallas_call(
        _ffx_kernel,
        out_shape=(jax.ShapeDtypeStruct((B, S, H, W), jnp.float32),
                   jax.ShapeDtypeStruct((B, S, H, W), jnp.float32)),
        grid_spec=pltpu.PrefetchScalarGridSpec(
            num_scalar_prefetch=0,
            grid=(B, S, H // h_tile),
            in_specs=[img_spec, img_spec, sm_spec, sm_spec, mw_spec, mw_spec],
            out_specs=[img_spec, img_spec]),
        compiler_params=pltpu.CompilerParams(
            dimension_semantics=("parallel", "parallel", "parallel"),
            vmem_limit_bytes=vmem_limit),
    )(cur_r, cur_i, sm_r, sm_i, mwr, mwi)


# ----------------------------------------------------------------------------
# Kernel 2: surrogate model heads + soft-DC + final image update as ONE matmul
#   per (B, HW-tile) step.  grid = (B, HWp // T); both axes parallel.
# ----------------------------------------------------------------------------
def _model_dc_kernel(w_ref, b_ref,
                     cur_r_ref, cur_i_ref, ffx_r_ref, ffx_i_ref,
                     lat_r_ref, lat_i_ref, zf_r_ref, zf_i_ref,
                     pred_r_ref, pred_i_ref, lat_nr_ref, lat_ni_ref):
    s = cur_r_ref.shape[1]
    # single (8S, T) operand; soft-DC + image update are folded into w/b so the
    # whole per-tile update is one MXU matmul (no 8 tiny dots, no 7 VPU adds).
    x = jnp.concatenate(
        [cur_r_ref[0], cur_i_ref[0], ffx_r_ref[0], ffx_i_ref[0],
         lat_r_ref[0], lat_i_ref[0], zf_r_ref[0], zf_i_ref[0]], axis=0)
    out = jnp.dot(w_ref[...], x, preferred_element_type=jnp.float32) + b_ref[...]
    pred_r_ref[0] = out[0 * s:1 * s]
    pred_i_ref[0] = out[1 * s:2 * s]
    lat_nr_ref[0] = out[2 * s:3 * s]
    lat_ni_ref[0] = out[3 * s:4 * s]


def _model_dc_pallas(w2, b2, planes, tile, vmem_limit):
    B, S, HWp = planes[0].shape

    plane_spec = pl.BlockSpec((1, S, tile), lambda b, t: (b, 0, t))
    w_spec = pl.BlockSpec(w2.shape, lambda b, t: (0, 0))
    b_spec = pl.BlockSpec(b2.shape, lambda b, t: (0, 0))

    return pl.pallas_call(
        _model_dc_kernel,
        out_shape=tuple(jax.ShapeDtypeStruct((B, S, HWp), jnp.float32)
                        for _ in range(4)),
        grid_spec=pltpu.PrefetchScalarGridSpec(
            num_scalar_prefetch=0,
            grid=(B, HWp // tile),
            in_specs=[w_spec, b_spec] + [plane_spec] * 8,
            out_specs=[plane_spec] * 4),
        compiler_params=pltpu.CompilerParams(
            dimension_semantics=("parallel", "parallel"),
            vmem_limit_bytes=vmem_limit),
    )(w2, b2, *planes)


def _fold_head_weights(params, S, nb):
    """Map the surrogate 1x1-conv heads onto the stacked-plane operand
    [cur_r, cur_i, ffx_r, ffx_i, lat_r, lat_i, zf_r, zf_i] (8S rows), folding
      (a) the (n_buffer-3) repeated (ffx - zf) channel blocks into effective
          ffx / zf weights,
      (b) the model head and latent head into one (4S, 8S) matrix,
      (c) soft-DC + image update  pred = cur - dcw*(ffx - zf) - model_term
          into the first 2S output rows (rows [2S,4S) are the new latent)."""
    wm, wl = params["wm"], params["wl"]            # (2S, 2*C1)
    bm, bl = params["bm"], params["bl"]            # (2S, 1)
    dcw = params["dc_weight"][0]
    w_full = jnp.concatenate([wm, wl], axis=0)     # (4S, 2*C1)
    O = w_full.shape[0]
    C1 = S * (1 + nb)

    def split_half(wh):
        cur = wh[:, 0:S]
        ffx = wh[:, S:2 * S]
        lat = wh[:, 2 * S:3 * S]
        zf = wh[:, 3 * S:4 * S]
        if nb > 3:
            rep = wh[:, 4 * S:].reshape(O, nb - 3, S).sum(axis=1)
            ffx = ffx + rep
            zf = zf - rep
        return cur, ffx, lat, zf

    cr, fr, lr, zr = split_half(w_full[:, :C1])    # columns hitting real planes
    ci, fi, li, zi = split_half(w_full[:, C1:])    # columns hitting imag planes
    w_lin = jnp.concatenate([cr, ci, fr, fi, lr, li, zr, zi], axis=1)   # (4S, 8S)
    b_lin = jnp.concatenate([bm, bl], axis=0)                            # (4S, 1)

    eye = jnp.eye(S, dtype=w_lin.dtype)
    z = jnp.zeros((S, S), w_lin.dtype)
    dc_r = jnp.concatenate([eye, z, -dcw * eye, z, z, z, dcw * eye, z], axis=1)
    dc_i = jnp.concatenate([z, eye, z, -dcw * eye, z, z, z, dcw * eye], axis=1)
    w_out = jnp.concatenate(
        [jnp.concatenate([dc_r, dc_i], axis=0) - w_lin[:2 * S], w_lin[2 * S:]],
        axis=0)                                                          # (4S, 8S)
    b_out = jnp.concatenate([-b_lin[:2 * S], b_lin[2 * S:]], axis=0)     # (4S, 1)
    return w_out, b_out


# ----------------------------------------------------------------------------
# PromptMRBlock.forward
# ----------------------------------------------------------------------------
def promptmr_block_planar(params, cur_r, cur_i, zf_r, zf_i, lat_r, lat_i,
                          sm_r, sm_i, mask, history_feat=None,
                          h_tile=None, hw_tile=None):
    """Block forward on planar (B, S, H, W) real/imag planes.  Use this entry
    point across cascades (no interleaved-complex split/stack per block)."""
    B, S, H, W = cur_r.shape
    assert sm_r.shape[1] % S == 0
    NC = sm_r.shape[1] // S
    nb = params["n_buffer"]
    assert nb >= 3, "buffer construction assumes n_buffer >= 3"

    vmem_limit = _vmem_limit_bytes()

    # folded column-mask operator (per batch)
    mwr, mwi = _masked_w_operator(mask, W)

    # kernel 1: ffx = sens_reduce(mask * sens_expand(cur)), tiled over H
    if h_tile is None:
        h_tile = _pick_h_tile(H, W, NC, vmem_limit // 2)
    assert H % h_tile == 0 and (h_tile % 8 == 0 or h_tile == H)
    ffx_r, ffx_i = _ffx_pallas(cur_r, cur_i, sm_r, sm_i, mwr, mwi,
                               h_tile, vmem_limit)

    # kernel 2: fused surrogate heads + soft-DC + image update over H*W tiles
    w2, b2 = _fold_head_weights(params, S, nb)
    HW = H * W
    HWp = ((HW + 127) // 128) * 128          # lane-dense tiles even for odd sizes

    def flat(a):
        a = a.reshape(B, S, HW)              # contiguous merge: free in HBM
        if HWp != HW:
            a = jnp.pad(a, ((0, 0), (0, 0), (0, HWp - HW)))
        return a

    if hw_tile is None:
        hw_tile = _pick_hw_tile(HWp, S, vmem_limit // 2)
    planes = [flat(cur_r), flat(cur_i), flat(ffx_r), flat(ffx_i),
              flat(lat_r), flat(lat_i), flat(zf_r), flat(zf_i)]
    pred_r, pred_i, lat_nr, lat_ni = _model_dc_pallas(w2, b2, planes,
                                                      hw_tile, vmem_limit)

    def unflat(a):
        if HWp != HW:
            a = a[:, :, :HW]
        return a.reshape(B, S, H, W)

    # TODO(synk): surrogate ignores n_history / history_feat (PromptUnet decoder
    #             history concat); passed through unchanged.
    return (unflat(pred_r), unflat(pred_i),
            unflat(lat_nr), unflat(lat_ni)), history_feat


def promptmr_block_apply(params, current_img, img_zf, latent, mask, sens_maps,
                         history_feat=None):
    """Complex-last (B, S, H, W, 2) API matching the PyTorch block.  The
    split/stack here is boundary-only; chain cascades with the planar API."""
    (pr, pi, lr, li), hist = promptmr_block_planar(
        params,
        current_img[..., 0], current_img[..., 1],
        img_zf[..., 0], img_zf[..., 1],
        latent[..., 0], latent[..., 1],
        sens_maps[..., 0], sens_maps[..., 1],
        mask, history_feat)
    img_pred = jnp.stack([pr, pi], axis=-1)
    latent_new = jnp.stack([lr, li], axis=-1)
    return img_pred, latent_new, hist


# ----------------------------------------------------------------------------
# pure-JAX reference (sanity check)
# ----------------------------------------------------------------------------
def _fft2c(x):
    return jnp.fft.fftshift(jnp.fft.fft2(jnp.fft.ifftshift(x, axes=(-2, -1)),
                                         norm="ortho"), axes=(-2, -1))


def _ifft2c(x):
    return jnp.fft.fftshift(jnp.fft.ifft2(jnp.fft.ifftshift(x, axes=(-2, -1)),
                                          norm="ortho"), axes=(-2, -1))


def _reference_forward(params, current_img, img_zf, latent, mask, sens_maps):
    B, S, H, W, _ = current_img.shape
    NC = sens_maps.shape[1] // S
    cur_c = current_img[..., 0] + 1j * current_img[..., 1]
    sm_c = sens_maps[..., 0] + 1j * sens_maps[..., 1]
    k = _fft2c(jnp.repeat(cur_c, NC, axis=1) * sm_c)
    k = jnp.where(mask[..., 0], k, 0)
    red = (_ifft2c(k) * jnp.conj(sm_c)).reshape(B, S, NC, H, W).sum(axis=2)
    ffx = jnp.stack([red.real, red.imag], axis=-1)
    nb = params["n_buffer"]
    buffer = jnp.concatenate([ffx, latent, img_zf] + [ffx - img_zf] * (nb - 3),
                             axis=1)
    x_in = jnp.concatenate([current_img, buffer], axis=1)
    feat = _complex_to_chan(x_in).reshape(B, -1, H * W)
    mt = jnp.einsum("oc,bcp->bop", params["wm"], feat) + params["bm"][None]
    lt = jnp.einsum("oc,bcp->bop", params["wl"], feat) + params["bl"][None]
    model_term = _chan_to_complex(mt.reshape(B, 2 * S, H, W))
    latent_new = _chan_to_complex(lt.reshape(B, 2 * S, H, W))
    soft_dc = (ffx - img_zf) * params["dc_weight"][0]
    img_pred = current_img - soft_dc - model_term
    return img_pred, latent_new


# ----------------------------------------------------------------------------
def _run_case(name, key, B, S, NC, H, W, nb, dc_value, h_tile=None):
    ks = jax.random.split(key, 8)
    current_img = jax.random.normal(ks[0], (B, S, H, W, 2), jnp.float32)
    img_zf = jax.random.normal(ks[1], (B, S, H, W, 2), jnp.float32)
    latent = jax.random.normal(ks[2], (B, S, H, W, 2), jnp.float32)
    sens_maps = jax.random.normal(ks[3], (B, S * NC, H, W, 2), jnp.float32) * 0.5

    # Cartesian (column-only) undersampling mask
    cols = jnp.arange(W)
    col_keep = (cols % 2 == 0) | ((cols >= W // 2 - 2) & (cols < W // 2 + 2))
    mask = jnp.broadcast_to(col_keep[None, None, None, :, None], (B, 1, H, W, 1))

    Cin = 2 * S * (1 + nb)      # real channels fed to the surrogate model
    Cm = 2 * S
    params = dict(
        dc_weight=jnp.full((1,), dc_value, jnp.float32),
        wm=jax.random.normal(ks[4], (Cm, Cin), jnp.float32) * 0.05,
        bm=jax.random.normal(ks[5], (Cm, 1), jnp.float32) * 0.05,
        wl=jax.random.normal(ks[6], (Cm, Cin), jnp.float32) * 0.05,
        bl=jax.random.normal(ks[7], (Cm, 1), jnp.float32) * 0.05,
        n_buffer=nb,
    )

    # planar inputs (recommended cascade-to-cascade layout); the [..., 0/1]
    # splits below are the one-time network-boundary conversion.
    (pr, pi, lr, li), _ = promptmr_block_planar(
        params,
        current_img[..., 0], current_img[..., 1],
        img_zf[..., 0], img_zf[..., 1],
        latent[..., 0], latent[..., 1],
        sens_maps[..., 0], sens_maps[..., 1],
        mask, history_feat=None, h_tile=h_tile)
    jax.block_until_ready((pr, pi, lr, li))

    img_pred = jnp.stack([pr, pi], axis=-1)        # test-harness only
    latent_new = jnp.stack([lr, li], axis=-1)

    ref_pred, ref_lat = _reference_forward(params, current_img, img_zf, latent,
                                           mask, sens_maps)
    rel = float(jnp.max(jnp.abs(img_pred - ref_pred)) /
                (jnp.max(jnp.abs(ref_pred)) + 1e-6))
    rel_l = float(jnp.max(jnp.abs(latent_new - ref_lat)) /
                  (jnp.max(jnp.abs(ref_lat)) + 1e-6))
    assert bool(jnp.all(jnp.isfinite(img_pred)))
    assert bool(jnp.all(jnp.isfinite(latent_new)))
    assert rel < 5e-2, f"{name}: img mismatch vs reference: rel_err={rel}"
    assert rel_l < 5e-2, f"{name}: latent mismatch vs reference: rel_err={rel_l}"


if __name__ == "__main__":
    key = jax.random.PRNGKey(0)
    k1, k2 = jax.random.split(key)

    # toy case (num_adj_slices = 5 as in the PromptMR default)
    _run_case("case1", k1, B=2, S=5, NC=2, H=16, W=16, nb=4, dc_value=1.0)

    # exercises the H-tiled kernel-1 grid, odd W (explicit conj(F) operator),
    # HW->128 padding path, n_buffer folding with 2 repeats, dc_weight != 1
    _run_case("case2", k2, B=1, S=3, NC=3, H=32, W=23, nb=5, dc_value=0.75,
              h_tile=8)

    print("KERNEL_OK")
</pallas_src>

<mosaic_0001>
module attributes {stable_mosaic.version = 11 : i64} {
  func.func @_ffx_kernel(%arg0: i32, %arg1: i32, %arg2: i32, %arg3: memref<1x1x16x16xf32, #tpu.memory_space<vmem>>, %arg4: memref<1x1x16x16xf32, #tpu.memory_space<vmem>>, %arg5: memref<1x2x16x16xf32, #tpu.memory_space<vmem>>, %arg6: memref<1x2x16x16xf32, #tpu.memory_space<vmem>>, %arg7: memref<1x16x16xbf16, #tpu.memory_space<vmem>>, %arg8: memref<1x16x16xbf16, #tpu.memory_space<vmem>>, %arg9: memref<1x1x16x16xf32, #tpu.memory_space<vmem>>, %arg10: memref<1x1x16x16xf32, #tpu.memory_space<vmem>>) attributes {dimension_semantics = [#tpu.dimension_semantics<parallel>, #tpu.dimension_semantics<parallel>, #tpu.dimension_semantics<parallel>], iteration_bounds = array<i64: 2, 5, 1>, scalar_prefetch = 0 : i64, scratch_operands = 0 : i64, tpu.core_type = #tpu.core_type<tc>, window_params = [{transform_indices = @transform_0, window_bounds = array<i64: 1, 1, 16, 16>}, {transform_indices = @transform_1, window_bounds = array<i64: 1, 1, 16, 16>}, {transform_indices = @transform_2, window_bounds = array<i64: 1, 2, 16, 16>}, {transform_indices = @transform_3, window_bounds = array<i64: 1, 2, 16, 16>}, {transform_indices = @transform_4, window_bounds = array<i64: 1, 16, 16>}, {transform_indices = @transform_5, window_bounds = array<i64: 1, 16, 16>}, {transform_indices = @transform_6, window_bounds = array<i64: 1, 1, 16, 16>}, {transform_indices = @transform_7, window_bounds = array<i64: 1, 1, 16, 16>}]} {
    %c0 = arith.constant 0 : index
    %c0_0 = arith.constant 0 : index
    %c0_1 = arith.constant 0 : index
    %c0_2 = arith.constant 0 : index
    %0 = vector.load %arg3[%c0, %c0_0, %c0_1, %c0_2] : memref<1x1x16x16xf32, #tpu.memory_space<vmem>>, vector<1x1x16x16xf32>
    %1 = vector.shape_cast %0 : vector<1x1x16x16xf32> to vector<16x16xf32>
    %c0_3 = arith.constant 0 : index
    %c0_4 = arith.constant 0 : index
    %c0_5 = arith.constant 0 : index
    %c0_6 = arith.constant 0 : index
    %2 = vector.load %arg4[%c0_3, %c0_4, %c0_5, %c0_6] : memref<1x1x16x16xf32, #tpu.memory_space<vmem>>, vector<1x1x16x16xf32>
    %3 = vector.shape_cast %2 : vector<1x1x16x16xf32> to vector<16x16xf32>
    %c0_7 = arith.constant 0 : index
    %c0_8 = arith.constant 0 : index
    %c0_9 = arith.constant 0 : index
    %c0_10 = arith.constant 0 : index
    %4 = vector.load %arg5[%c0_7, %c0_8, %c0_9, %c0_10] : memref<1x2x16x16xf32, #tpu.memory_space<vmem>>, vector<1x2x16x16xf32>
    %5 = vector.shape_cast %4 : vector<1x2x16x16xf32> to vector<2x16x16xf32>
    %c0_11 = arith.constant 0 : index
    %c0_12 = arith.constant 0 : index
    %c0_13 = arith.constant 0 : index
    %c0_14 = arith.constant 0 : index
    %6 = vector.load %arg6[%c0_11, %c0_12, %c0_13, %c0_14] : memref<1x2x16x16xf32, #tpu.memory_space<vmem>>, vector<1x2x16x16xf32>
    %7 = vector.shape_cast %6 : vector<1x2x16x16xf32> to vector<2x16x16xf32>
    %8 = vector.shape_cast %1 : vector<16x16xf32> to vector<1x16x16xf32>
    %9 = vector.broadcast %8 : vector<1x16x16xf32> to vector<2x16x16xf32>
    %10 = arith.mulf %9, %5 : vector<2x16x16xf32>
    %11 = vector.shape_cast %3 : vector<16x16xf32> to vector<1x16x16xf32>
    %12 = vector.broadcast %11 : vector<1x16x16xf32> to vector<2x16x16xf32>
    %13 = arith.mulf %12, %7 : vector<2x16x16xf32>
    %14 = arith.subf %10, %13 : vector<2x16x16xf32>
    %15 = vector.shape_cast %1 : vector<16x16xf32> to vector<1x16x16xf32>
    %16 = vector.broadcast %15 : vector<1x16x16xf32> to vector<2x16x16xf32>
    %17 = arith.mulf %16, %7 : vector<2x16x16xf32>
    %18 = vector.shape_cast %3 : vector<16x16xf32> to vector<1x16x16xf32>
    %19 = vector.broadcast %18 : vector<1x16x16xf32> to vector<2x16x16xf32>
    %20 = arith.mulf %19, %5 : vector<2x16x16xf32>
    %21 = arith.addf %17, %20 : vector<2x16x16xf32>
    %22 = vector.shape_cast %14 : vector<2x16x16xf32> to vector<32x16xf32>
    %23 = arith.truncf %22 : vector<32x16xf32> to vector<32x16xbf16>
    %24 = vector.shape_cast %21 : vector<2x16x16xf32> to vector<32x16xf32>
    %25 = arith.truncf %24 : vector<32x16xf32> to vector<32x16xbf16>
    %c0_15 = arith.constant 0 : index
    %c0_16 = arith.constant 0 : index
    %c0_17 = arith.constant 0 : index
    %26 = vector.load %arg7[%c0_15, %c0_16, %c0_17] : memref<1x16x16xbf16, #tpu.memory_space<vmem>>, vector<1x16x16xbf16>
    %27 = vector.shape_cast %26 : vector<1x16x16xbf16> to vector<16x16xbf16>
    %c0_18 = arith.constant 0 : index
    %c0_19 = arith.constant 0 : index
    %c0_20 = arith.constant 0 : index
    %28 = vector.load %arg8[%c0_18, %c0_19, %c0_20] : memref<1x16x16xbf16, #tpu.memory_space<vmem>>, vector<1x16x16xbf16>
    %29 = vector.shape_cast %28 : vector<1x16x16xbf16> to vector<16x16xbf16>
    %cst = arith.constant dense<0.000000e+00> : vector<32x16xf32>
    %30 = tpu.matmul %23, %27, %cst {dimension_numbers = #tpu.dot_dimension_numbers<[1], [0], [0], [1], [0, 0, 1, 1], [], []>} : vector<32x16xbf16>, vector<16x16xbf16>, vector<32x16xf32> -> vector<32x16xf32>
    %cst_21 = arith.constant dense<0.000000e+00> : vector<32x16xf32>
    %31 = tpu.matmul %25, %29, %cst_21 {dimension_numbers = #tpu.dot_dimension_numbers<[1], [0], [0], [1], [0, 0, 1, 1], [], []>} : vector<32x16xbf16>, vector<16x16xbf16>, vector<32x16xf32> -> vector<32x16xf32>
    %32 = arith.subf %30, %31 : vector<32x16xf32>
    %33 = vector.shape_cast %32 : vector<32x16xf32> to vector<2x16x16xf32>
    %cst_22 = arith.constant dense<0.000000e+00> : vector<32x16xf32>
    %34 = tpu.matmul %23, %29, %cst_22 {dimension_numbers = #tpu.dot_dimension_numbers<[1], [0], [0], [1], [0, 0, 1, 1], [], []>} : vector<32x16xbf16>, vector<16x16xbf16>, vector<32x16xf32> -> vector<32x16xf32>
    %cst_23 = arith.constant dense<0.000000e+00> : vector<32x16xf32>
    %35 = tpu.matmul %25, %27, %cst_23 {dimension_numbers = #tpu.dot_dimension_numbers<[1], [0], [0], [1], [0, 0, 1, 1], [], []>} : vector<32x16xbf16>, vector<16x16xbf16>, vector<32x16xf32> -> vector<32x16xf32>
    %36 = arith.addf %34, %35 : vector<32x16xf32>
    %37 = vector.shape_cast %36 : vector<32x16xf32> to vector<2x16x16xf32>
    %38 = arith.mulf %33, %5 : vector<2x16x16xf32>
    %39 = arith.mulf %37, %7 : vector<2x16x16xf32>
    %40 = arith.addf %38, %39 : vector<2x16x16xf32>
    %cst_24 = arith.constant dense<0.000000e+00> : vector<16x16xf32>
    %41 = vector.multi_reduction <add>, %40, %cst_24 [0] : vector<2x16x16xf32> to vector<16x16xf32>
    %c0_25 = arith.constant 0 : index
    %c0_26 = arith.constant 0 : index
    %c0_27 = arith.constant 0 : index
    %c0_28 = arith.constant 0 : index
    %42 = vector.load %arg9[%c0_25, %c0_26, %c0_27, %c0_28] : memref<1x1x16x16xf32, #tpu.memory_space<vmem>>, vector<1x1x16x16xf32>
    %43 = vector.shape_cast %42 : vector<1x1x16x16xf32> to vector<16x16xf32>
    %44 = vector.shape_cast %41 : vector<16x16xf32> to vector<1x1x16x16xf32>
    tpu.vector_store %arg9[%c0_25, %c0_26, %c0_27, %c0_28], %44 {strides = array<i32>} : memref<1x1x16x16xf32, #tpu.memory_space<vmem>>, vector<1x1x16x16xf32>,
    %45 = arith.mulf %37, %5 : vector<2x16x16xf32>
    %46 = arith.mulf %33, %7 : vector<2x16x16xf32>
    %47 = arith.subf %45, %46 : vector<2x16x16xf32>
    %cst_29 = arith.constant dense<0.000000e+00> : vector<16x16xf32>
    %48 = vector.multi_reduction <add>, %47, %cst_29 [0] : vector<2x16x16xf32> to vector<16x16xf32>
    %c0_30 = arith.constant 0 : index
    %c0_31 = arith.constant 0 : index
    %c0_32 = arith.constant 0 : index
    %c0_33 = arith.constant 0 : index
    %49 = vector.load %arg10[%c0_30, %c0_31, %c0_32, %c0_33] : memref<1x1x16x16xf32, #tpu.memory_space<vmem>>, vector<1x1x16x16xf32>
    %50 = vector.shape_cast %49 : vector<1x1x16x16xf32> to vector<16x16xf32>
    %51 = vector.shape_cast %48 : vector<16x16xf32> to vector<1x1x16x16xf32>
    tpu.vector_store %arg10[%c0_30, %c0_31, %c0_32, %c0_33], %51 {strides = array<i32>} : memref<1x1x16x16xf32, #tpu.memory_space<vmem>>, vector<1x1x16x16xf32>,
    return
  }
  func.func @transform_0(%arg0: i32, %arg1: i32, %arg2: i32) -> (i32, i32, i32, i32) {
    %c0_i32 = arith.constant 0 : i32
    %c0_i32_0 = arith.constant 0 : i32
    return %arg0, %arg1, %arg2, %c0_i32 : i32, i32, i32, i32
  }
  func.func @transform_1(%arg0: i32, %arg1: i32, %arg2: i32) -> (i32, i32, i32, i32) {
    %c0_i32 = arith.constant 0 : i32
    %c0_i32_0 = arith.constant 0 : i32
    return %arg0, %arg1, %arg2, %c0_i32 : i32, i32, i32, i32
  }
  func.func @transform_2(%arg0: i32, %arg1: i32, %arg2: i32) -> (i32, i32, i32, i32) {
    %c0_i32 = arith.constant 0 : i32
    %c0_i32_0 = arith.constant 0 : i32
    return %arg0, %arg1, %arg2, %c0_i32 : i32, i32, i32, i32
  }
  func.func @transform_3(%arg0: i32, %arg1: i32, %arg2: i32) -> (i32, i32, i32, i32) {
    %c0_i32 = arith.constant 0 : i32
    %c0_i32_0 = arith.constant 0 : i32
    return %arg0, %arg1, %arg2, %c0_i32 : i32, i32, i32, i32
  }
  func.func @transform_4(%arg0: i32, %arg1: i32, %arg2: i32) -> (i32, i32, i32) {
    %c0_i32 = arith.constant 0 : i32
    %c0_i32_0 = arith.constant 0 : i32
    %c0_i32_1 = arith.constant 0 : i32
    return %arg0, %c0_i32, %c0_i32_0 : i32, i32, i32
  }
  func.func @transform_5(%arg0: i32, %arg1: i32, %arg2: i32) -> (i32, i32, i32) {
    %c0_i32 = arith.constant 0 : i32
    %c0_i32_0 = arith.constant 0 : i32
    %c0_i32_1 = arith.constant 0 : i32
    return %arg0, %c0_i32, %c0_i32_0 : i32, i32, i32
  }
  func.func @transform_6(%arg0: i32, %arg1: i32, %arg2: i32) -> (i32, i32, i32, i32) {
    %c0_i32 = arith.constant 0 : i32
    %c0_i32_0 = arith.constant 0 : i32
    return %arg0, %arg1, %arg2, %c0_i32 : i32, i32, i32, i32
  }
  func.func @transform_7(%arg0: i32, %arg1: i32, %arg2: i32) -> (i32, i32, i32, i32) {
    %c0_i32 = arith.constant 0 : i32
    %c0_i32_0 = arith.constant 0 : i32
    return %arg0, %arg1, %arg2, %c0_i32 : i32, i32, i32, i32
  }
}

</mosaic_0001>

<bundles_post_ra>
// kernel: tpu_custom_call.1
= control target key start
LH: loop header
LB: loop body
LE: loop exit
PB: predicated region body
PF: predicated region fallthrough
CT: control target
= control target key end

     0   :  { %s2284_s0 = inlined_call_operand.hbm [shape: f32[2,5,16,16], index: 0, kind: input, shape index: {}]   ;;  %s2285_s1 = inlined_call_operand.hbm [shape: f32[2,5,16,16], index: 1, kind: input, shape index: {}]   ;;  %s2286_s2 = inlined_call_operand.hbm [shape: f32[2,10,16,16], index: 2, kind: input, shape index: {}]   ;;  %s2287_s3 = inlined_call_operand.hbm [shape: f32[2,10,16,16], index: 3, kind: input, shape index: {}]   ;;  %s2288_s4 = inlined_call_operand.hbm [shape: bf16[2,16,16], index: 4, kind: input, shape index: {}]   ;;  %s2289_s5 = inlined_call_operand.hbm [shape: bf16[2,16,16], index: 5, kind: input, shape index: {}]   ;;  %s2290_s6 = inlined_call_operand.hbm [shape: f32[2,5,16,16], index: 6, kind: output, shape index: {0}]   ;;  %s2291_s7 = inlined_call_operand.hbm [shape: f32[2,5,16,16], index: 7, kind: output, shape index: {1}]  }
   0x1   :  { %2315 = sst [smem:[#allocation36_spill]] %s2285_s1 }
   0x2   :  { %2316 = sst [smem:[#allocation37_spill]] %s2286_s2 }
   0x3   :  { %2317 = sst [smem:[#allocation38_spill]] %s2288_s4 }
   0x4   :  { %2318 = sst [smem:[#allocation39_spill]] %s2289_s5 }
   0x5   :  { %2319 = sst [smem:[#allocation40_spill]] %s2290_s6 }
   0x6   :  { %2320 = sst [smem:[#allocation41_spill]] %s2291_s7 }
   0x7   :  { %13 = vsyncpa [#allocation3], 0 }
   0x8   :  { %15 = vsyncpa [#allocation3 + $0x1], 0 }
   0x9   :  { %16 = vsyncpa [#allocation6], 0 }
   0xa   :  { %18 = vsyncpa [#allocation6 + $0x1], 0 }
   0xb   :  { %19 = vsyncpa [#allocation9], 0 }
   0xc   :  { %21 = vsyncpa [#allocation9 + $0x1], 0 }
   0xd   :  { %22 = vsyncpa [#allocation12], 0 }
   0xe   :  { %24 = vsyncpa [#allocation12 + $0x1], 0 }
   0xf   :  { %25 = vsyncpa [#allocation4], 0 }
  0x10   :  { %27 = vsyncpa [#allocation4 + $0x1], 0 }
  0x11   :  { %28 = vsyncpa [#allocation15], 0 }
  0x12   :  { %30 = vsyncpa [#allocation15 + $0x1], 0  ;;  %s1809_s24 = smov 0   ;;  %s1811_s25 = smov 0  }
  0x13   :  { %s1813_s26 = smov 0   ;;  %s1815_s27 = smov 0  }
  0x14   :  { %s1817_s28 = smov 0   ;;  %s1819_s29 = smov 0  }
  0x15   :  { %s1821_s30 = smov 0   ;;  %s1823_s8 = smov 0  }
  0x16   :  { %s1825_s9 = smov 0   ;;  %s1827_s10 = smov 0  }
  0x17   :  { %s1829_s11 = smov 0  }
  0x18 LB: > { %2321 = sst [smem:[#allocation23_spill]] %s1725_s27  ;;  %s1865_s12 = sadd.s32 4294967295, %s1753_s11   ;;  %s1753_s11 = sphi %s1829_s11, %s36_s11   ;;  %s1749_s10 = sphi %s1827_s10, %s2376_s10   ;;  %s1745_s9 = sphi %s1825_s9, %s2370_s9   ;;  %s1741_s8 = sphi %s1823_s8, %s2375_s8   ;;  %s1737_s30 = sphi %s1821_s30, %s2369_s30   ;;  %s1733_s29 = sphi %s1819_s29, %s2368_s29   ;;  %s1729_s28 = sphi %s1817_s28, %s2367_s28   ;;  %s1725_s27 = sphi %s1815_s27, %s2366_s27   ;;  %s1721_s26 = sphi %s1813_s26, %s2374_s26   ;;  %s1717_s25 = sphi %s1811_s25, %s2373_s25   ;;  %s1713_s24 = sphi %s1809_s24, %s2372_s24  }
  0x19   : > { %2322 = sst [smem:[#allocation24_spill]] %s1729_s28  ;;  %s1183_s13 = sadd.s32 4294967294, %s1753_s11  }
  0x1a   : > { %2323 = sst [smem:[#allocation25_spill]] %s1733_s29  ;;  %s51_s14 = sadd.s32 1, %s1745_s9 }
  0x1b   : > { %2324 = sst [smem:[#allocation26_spill]] %s1737_s30  ;;  %s55_s15 = sadd.s32 1, %s1749_s10 }
  0x1c   : > { %2325 = sst [smem:[#allocation27_spill]] %s1741_s8  ;;  %p53_p0 = scmp.ge.s32.totalorder %s51_s14, 5 }
  0x1d   : > { %2326 = sst [smem:[#allocation28_spill]] %s1745_s9  ;;  %s66_s16 = sadd.s32 1, %s1733_s29 }
  0x1e   : > { %p73_p1 = scmp.ne.s32.totalorder %s1733_s29, %s1729_s28  ;;  %p2303_p2 = scmp.eq.s32.totalorder %s1753_s11, 0 }
  0x1f   : > { %s2378_s14 = smov (%p53_p0, %s51_s14), 0  ;;  %s2380_s15 = smov (!%p53_p0, %s55_s15), %s1749_s10 }
  0x20   : > { %2327 = sst [smem:[#allocation29_spill]] %s2378_s14  ;;  %s60_s17 = ssub.s32 %s1745_s9, %s2378_s14 }
  0x21   : > { %p1881_p3 = por %p2303_p2, %p73_p1  ;;  %p57_p4 = scmp.ge.s32.totalorder %s2380_s15, 2 }
  0x22   : > { %p79_p5 = scmp.ne.s32.totalorder %s1729_s28, %s1725_s27  ;;  %p2302_p6 = scmp.eq.s32.totalorder %s1865_s12, 0 }
  0x23   : > { %p249_p7 = scmp.eq.s32.totalorder %s1865_s12, 9  ;;  %s2382_s15 = smov (%p57_p4, %s2380_s15), 0 }
  0x24   : > { %2329 = sst [smem:[#allocation30_spill]] %s2382_s15  ;;  %p1893_p8 = por %p2302_p6, %p79_p5 }
  0x25   : > { %p1897_p9 = por %p249_p7, %p73_p1  ;;  %s1903_s21 = ssub.s32 %s1749_s10, %s2382_s15 }
  0x26   : > { %s2330_s19 = scalar_select %p1893_p8, 1, 0 }
  0x27   : > { %s2332_s20 = scalar_select %p1897_p9, 1, 0 }
  0x28   : > { %2331 = sst [smem:[#allocation31_spill]] %s2330_s19  ;;  %p255_p10 = scmp.eq.s32.totalorder %s1183_s13, 9 }
  0x29   : > { %2333 = sst [smem:[#allocation32_spill]] %s2332_s20  ;;  %s61_s22 = sor.u32 %s60_s17, %s1903_s21 }
  0x2a   : > { %p64_p12 = scmp.eq.s32.totalorder %s61_s22, 0  ;;  %p1907_p13 = por %p255_p10, %p79_p5 }
  0x2b   : > { %p2301_p0 = scmp.lt.s32.totalorder %s1753_s11, 10  ;;  %s1916_s27 = sand.u32 1, %s1733_s29  }
  0x2c   : > { %s2334_s23 = scalar_select %p1907_p13, 1, 0 }
  0x2d   : > { %s1913_s14 = scalar_select %p64_p12, %s1733_s29, %s66_s16  }
  0x2e   : > { %2335 = sst [smem:[#allocation33_spill]] %s2334_s23  ;;  %s1187_s15 = sshll.u32 %s1745_s9, 1 }
  0x2f   : > { %2336 = sst [smem:[#allocation34_spill]] %s1913_s14  ;;  %s1273_s13 = smul.u32 10, %s1749_s10 }
  0x30   : > { %p1925_p1 = pnand %p2301_p0, %p1881_p3  ;;  %s2305_s14 = sand.u32 1, %s1753_s11  }
  0x31   : > { %s1929_s22 = sadd.s32 %s1273_s13, %s1187_s15  ;;  %s2338_s1 = sld [smem:[#allocation36_spill]] }
  0x32   : > { %s2304_s16 = sshll.u32 %s1929_s22, 7  ;;  %s2339_s20 = sshll.u32 %s1916_s27, 4 }
  0x33   : > { %s334_s18 = scalar_lea.vmem [#allocation5], %s2339_s20  ;;  %p1206_p3 = scmp.ge.s32.totalorder %s1753_s11, 1 }
  0x34   : > { %s345_s6 = sshll.u32 %s334_s18, 4  ;;  %p447_p4 = scmp.lt.s32.totalorder %s1753_s11, 11  ;;  %s346_s6 = int_to_ptr.vmem [resolvable:$true] %s345_s6 }
  0x35   : > { %s1944_s30 = scalar_lea.sflag [#allocation6], %s2305_s14  ;;  %p1421_p5 = pneg %p1925_p1 }
  0x36   : > { %s1432_s15 = scalar_lea.vmem %s346_s6, 256  ;;  %s1755_s13 = smov [#allocation5]  }
  0x37   : > { %s344_s7 = scalar_lea.hbm %s2338_s1, %s2304_s16  ;;  %p1433_p7 = scmp.ne.s32.totalorder %s346_s6, %s1432_s15 }
  0x38   : > { %s1437_s29 = sshll.u32 %s1755_s13, 4  ;;  %s1438_s29 = int_to_ptr.vmem [resolvable:$false] %s1437_s29 }
  0x39   : > { %p1435_p10 = pnand %p1433_p7, %p1421_p5  ;;  %s1439_s23 = scalar_lea.vmem %s1438_s29, 512 }
  0x3a   : > { %p1440_p0 = scmp.lt.s32.totalorder %s346_s6, %s1438_s29  ;;  %p1441_p6 = scmp.lt.s32.totalorder %s1439_s23, %s1432_s15 }
  0x3b   : > { %p1436_p12 = pneg %p1435_p10 }
  0x3c   : > { %p1442_p2 = por %p1441_p6, %p1440_p0 }
  0x3e   : > { %p1443_p11 = pnand %p1442_p2, %p1436_p12 }
  0x40   : > { %1446 = shalt.err (!%p1443_p11)
}
  0x41   : > { %s2309_s20 = smov 128   ;;  %s2311_s18 = smov 8  }
  0x42   : > { %1301 = dma.hbm_to_vmem [thread:$0]  (!%p1925_p1), %s344_s7, 256, %s346_s6, %s1944_s30, %s2309_s20, %s2309_s20, %s2311_s18  }
  0x43   : > { %p1961_p6 = pnand %p1206_p3, %p447_p4  ;;  %s1192_s13 = sshll.u32 %s1916_s27, 5 }
  0x44   : > { %s1233_s29 = sshll.u32 %s1745_s9, 2  ;;  %s1275_s23 = smul.u32 20, %s1749_s10 }
  0x45   : > { %s2340_s15 = scalar_select %p1961_p6, 1, 0 }
  0x46   : > { %s359_s16 = scalar_lea.vmem [#allocation7], %s1192_s13  ;;  %s368_s1 = sadd.s32 %s1275_s23, %s1233_s29 }
  0x47   : > { %2341 = sst [smem:[#allocation35_spill]] %s2340_s15  ;;  %s371_s14 = sshll.u32 %s359_s16, 4  ;;  %s1968_s14 = int_to_ptr.vmem [resolvable:$true] %s371_s14 }
  0x48   : > { %s1195_s8 = sshll.u32 %s368_s1, 7  ;;  %s385_s19 = scalar_lea.vmem [#allocation8], %s1192_s13 }
  0x49   : > { %s397_s28 = sshll.u32 %s385_s19, 4  ;;  %s2342_s2 = sld [smem:[#allocation37_spill]]  ;;  %s398_s28 = int_to_ptr.vmem [resolvable:$true] %s397_s28 }
  0x4a   : > { %s396_s15 = scalar_lea.hbm %s2287_s3, %s1195_s8  ;;  %s2343_s9 = sand.u32 1, %s1753_s11  }
  0x4b   : > { %s1980_s4 = scalar_lea.sflag [#allocation9], %s2343_s9  ;;  %s1460_s16 = scalar_lea.vmem %s398_s28, 512 }
  0x4c   : > { %p1461_p2 = scmp.ne.s32.totalorder %s398_s28, %s1460_s16  ;;  %s1758_s1 = smov [#allocation8]  }
  0x4d   : > { %s1465_s19 = sshll.u32 %s1758_s1, 4  ;;  %s1466_s19 = int_to_ptr.vmem [resolvable:$false] %s1465_s19 }
  0x4e   : > { %p1463_p11 = pnand %p1461_p2, %p1421_p5  ;;  %s1467_s5 = scalar_lea.vmem %s1466_s19, 1024 }
  0x4f   : > { %s1973_s7 = scalar_lea.hbm %s2342_s2, %s1195_s8  ;;  %p1468_p3 = scmp.lt.s32.totalorder %s398_s28, %s1466_s19 }
  0x50   : > { %p1464_p0 = pneg %p1463_p11  ;;  %p1469_p4 = scmp.lt.s32.totalorder %s1467_s5, %s1460_s16 }
  0x52   : > { %p1470_p7 = por %p1469_p4, %p1468_p3 }
  0x54   : > { %p1471_p10 = pnand %p1470_p7, %p1464_p0 }
  0x56   : > { %1474 = shalt.err (!%p1471_p10)
}
  0x57   : > { %s2344_s8 = smov 8   ;;  %s2345_s9 = smov 128  }
  0x58   : > { %1307 = dma.hbm_to_vmem [thread:$0]  (!%p1925_p1), %s396_s15, 512, %s398_s28, %s1980_s4, %s2345_s9, %s2345_s9, %s2344_s8  }
  0x59   : > { %s2346_s20 = sshll.u32 %s1929_s22, 7  ;;  %s2347_s23 = sshll.u32 %s1916_s27, 4 }
  0x5a   : > { %s319_s29 = scalar_lea.hbm %s2284_s0, %s2346_s20  ;;  %s309_s6 = scalar_lea.vmem [#allocation2], %s2347_s23 }
  0x5b   : > { %s320_s16 = sshll.u32 %s309_s6, 4  ;;  %s306_s1 = scalar_lea.sflag [#allocation3], %s1916_s27  ;;  %s321_s16 = int_to_ptr.vmem [resolvable:$true] %s320_s16 }
  0x5c   : > { %s1488_s19 = scalar_lea.vmem %s321_s16, 256  ;;  %s1759_s5 = smov [#allocation2]  }
  0x5d   : > { %p1489_p12 = scmp.ne.s32.totalorder %s321_s16, %s1488_s19  ;;  %s1493_s2 = sshll.u32 %s1759_s5, 4  ;;  %s1494_s2 = int_to_ptr.vmem [resolvable:$false] %s1493_s2 }
  0x5e   : > { %s1495_s28 = scalar_lea.vmem %s1494_s2, 512  ;;  %p1496_p0 = scmp.lt.s32.totalorder %s321_s16, %s1494_s2 }
  0x5f   : > { %p1491_p2 = pnand %p1489_p12, %p1421_p5  ;;  %p1497_p3 = scmp.lt.s32.totalorder %s1495_s28, %s1488_s19 }
  0x61   : > { %p1492_p11 = pneg %p1491_p2  ;;  %p1498_p4 = por %p1497_p3, %p1496_p0 }
  0x63   : > { %p1499_p7 = pnand %p1498_p4, %p1492_p11 }
  0x65   : > { %1502 = shalt.err (!%p1499_p7)
}
  0x66   : > { %1298 = dma.hbm_to_vmem [thread:$0]  (!%p1925_p1), %s319_s29, 256, %s321_s16, %s306_s1, %s2345_s9, %s2345_s9, %s2344_s8  }
  0x67   : > { %s1516_s27 = scalar_lea.vmem %s1968_s14, 512  ;;  %s1760_s2 = smov [#allocation7]  }
  0x68   : > { %p1517_p10 = scmp.ne.s32.totalorder %s1968_s14, %s1516_s27  ;;  %s1521_s22 = sshll.u32 %s1760_s2, 4  ;;  %s1522_s22 = int_to_ptr.vmem [resolvable:$false] %s1521_s22 }
  0x69   : > { %s1523_s15 = scalar_lea.vmem %s1522_s22, 1024  ;;  %p1524_p11 = scmp.lt.s32.totalorder %s1968_s14, %s1522_s22 }
  0x6a   : > { %p1519_p12 = pnand %p1517_p10, %p1421_p5  ;;  %p1525_p0 = scmp.lt.s32.totalorder %s1523_s15, %s1516_s27 }
  0x6c   : > { %p1520_p2 = pneg %p1519_p12  ;;  %p1526_p3 = por %p1525_p0, %p1524_p11 }
  0x6e   : > { %p1527_p4 = pnand %p1526_p3, %p1520_p2 }
  0x70   : > { %1530 = shalt.err (!%p1527_p4)
}
  0x71   : > { %1304 = dma.hbm_to_vmem [thread:$0]  (!%p1925_p1), %s1973_s7, 512, %s1968_s14, %s1944_s30, %s2345_s9, %s2345_s9, %s2344_s8  }
  0x72   : > { %s182_s17 = sadd.s32 1, %s1721_s26  ;;  %p189_p5 = scmp.ne.s32.totalorder %s1721_s26, %s1717_s25 }
  0x73   : > { %p2348_p7 = scmp.eq.s32.totalorder %s1903_s21, 0  ;;  %p2349_p10 = scmp.eq.s32.totalorder %s1753_s11, 0 }
  0x74   : > { %p195_p2 = scmp.ne.s32.totalorder %s1717_s25, %s1713_s24  ;;  %s409_s18 = sand.u32 1, %s1721_s26  }
  0x75   : > { %s2027_s20 = scalar_select %p2348_p7, %s1721_s26, %s182_s17  }
  0x76   : > { %p191_p12 = por %p189_p5, %p2349_p10  ;;  %s1235_s13 = sshll.u32 %s1749_s10, 7 }
  0x77   : > { %p2350_p11 = scmp.eq.s32.totalorder %s1865_s12, 0  ;;  %s1200_s23 = sshll.u32 %s409_s18, 3 }
  0x78   : > { %s2352_s14 = sld [smem:[#allocation38_spill]]  ;;  %s411_s21 = scalar_lea.vmem [#allocation10], %s1200_s23 }
  0x79   : > { %p2037_p0 = por %p195_p2, %p2350_p11  ;;  %s418_s8 = sshll.u32 %s411_s21, 4  ;;  %s419_s8 = int_to_ptr.vmem [resolvable:$true] %s418_s8 }
  0x7a   : > { %p2353_p1 = scmp.lt.s32.totalorder %s1753_s11, 10  ;;  %s1544_s24 = scalar_lea.vmem %s419_s8, 128 }
  0x7b   : > { %p1545_p5 = scmp.ne.s32.totalorder %s419_s8, %s1544_s24  ;;  %s1761_s16 = smov [#allocation10]  }
  0x7c   : > { %p2050_p3 = pnand %p2353_p1, %p191_p12  ;;  %s1549_s1 = sshll.u32 %s1761_s16, 4  ;;  %s1550_s1 = int_to_ptr.vmem [resolvable:$false] %s1549_s1 }
  0x7d   : > { %s1551_s19 = scalar_lea.vmem %s1550_s1, 256  ;;  %p1552_p2 = scmp.lt.s32.totalorder %s419_s8, %s1550_s1 }
  0x7e   : > { %s417_s7 = scalar_lea.hbm %s2352_s14, %s1235_s13  ;;  %p1533_p4 = pneg %p2050_p3 }
  0x7f   : > { %p1553_p12 = scmp.lt.s32.totalorder %s1551_s19, %s1544_s24 }
  0x80   : > { %p1547_p7 = pnand %p1545_p5, %p1533_p4 }
  0x81   : > { %p1554_p11 = por %p1553_p12, %p1552_p2 }
  0x82   : > { %p1548_p10 = pneg %p1547_p7 }
  0x84   : > { %p1555_p1 = pnand %p1554_p11, %p1548_p10 }
  0x86   : > { %1558 = shalt.err (!%p1555_p1)
}
  0x87   : > { %s1762_s5 = smov 64   ;;  %s1763_s28 = smov 4  }
  0x88   : > { %1310 = dma.hbm_to_vmem [thread:$0]  (!%p2050_p3), %s417_s7, 128, %s419_s8, %s1980_s4, %s1762_s5, %s1762_s5, %s1763_s28  }
  0x89   : > { %s2355_s22 = sld [smem:[#allocation39_spill]]  ;;  %s432_s17 = scalar_lea.vmem [#allocation11], %s1200_s23 }
  0x8a   : > { %s439_s6 = sshll.u32 %s432_s17, 4  ;;  %s429_s30 = scalar_lea.sflag [#allocation12], %s409_s18  ;;  %s440_s6 = int_to_ptr.vmem [resolvable:$true] %s439_s6 }
  0x8b   : > { %s1572_s14 = scalar_lea.vmem %s440_s6, 128  ;;  %s1764_s21 = smov [#allocation11]  }
  0x8c   : > { %p1573_p5 = scmp.ne.s32.totalorder %s440_s6, %s1572_s14  ;;  %s1577_s24 = sshll.u32 %s1764_s21, 4  ;;  %s1578_s24 = int_to_ptr.vmem [resolvable:$false] %s1577_s24 }
  0x8d   : > { %s1579_s4 = scalar_lea.vmem %s1578_s24, 256  ;;  %p1580_p2 = scmp.lt.s32.totalorder %s440_s6, %s1578_s24 }
  0x8e   : > { %p1575_p7 = pnand %p1573_p5, %p1533_p4  ;;  %p1581_p12 = scmp.lt.s32.totalorder %s1579_s4, %s1572_s14 }
  0x8f   : > { %s438_s15 = scalar_lea.hbm %s2355_s22, %s1235_s13 }
  0x90   : > { %p1576_p10 = pneg %p1575_p7  ;;  %p1582_p11 = por %p1581_p12, %p1580_p2 }
  0x92   : > { %p1583_p1 = pnand %p1582_p11, %p1576_p10 }
  0x94   : > { %1586 = shalt.err (!%p1583_p1)
}
  0x95   : > { %1313 = dma.hbm_to_vmem [thread:$0]  (!%p2050_p3), %s438_s15, 128, %s440_s6, %s429_s30, %s1762_s5, %s1762_s5, %s1763_s28  }
  0x96   : > { %451 = sbr.rel (%p1961_p6) target bundleno = 439 (0x1b7), region = 44  ;;  %s2357_s18 = sld [smem:[#allocation24_spill]] (!%p1961_p6) }
  0x9c   : > { %s2077_s7 = sand.u32 1, %s2357_s18  }
  0x9d   : > { %s2080_s8 = sshll.u32 %s2077_s7, 4  ;;  %s454_s16 = scalar_lea.sflag [#allocation3], %s2077_s7 }
  0x9e   : > { %s457_s1 = scalar_lea.vmem [#allocation2], %s2080_s8 }
  0x9f   : > { %1684 = dma.done.wait (%p1893_p8), %s454_s16, 256  }
  0xa0   : > { %1686 = vsyncadd (%p1893_p8), %s454_s16, 4294967040  ;;  %s462_s9 = sand.u32 1, %s1865_s12   ;;  %s466_s5 = scalar_lea.vmem [#allocation5], %s2080_s8 }
  0xa1   : > { %s463_s19 = scalar_lea.sflag [#allocation6], %s462_s9 }
  0xa2   : > { %1688 = dma.done.wait (%p1893_p8), %s463_s19, 768  }
  0xa3   : > { %1690 = vsyncadd (%p1893_p8), %s463_s19, 4294966528  ;;  %s1209_s28 = sshll.u32 %s2077_s7, 5  ;;  %s481_s2 = scalar_lea.sflag [#allocation9], %s462_s9 }
  0xa4   : > { %s2095_s27 = scalar_lea.vmem [#allocation7], %s1209_s28  ;;  %s2097_s22 = scalar_lea.vmem [#allocation8], %s1209_s28 }
  0xa5   : > { %1692 = dma.done.wait (%p1893_p8), %s481_s2, 512  }
  0xa6   : > { %1694 = vsyncadd (%p1893_p8), %s481_s2, 4294966784  ;;  %s491_s12 = sand.u32 1, %s1717_s25  }
  0xa7   : > { %s1211_s15 = sshll.u32 %s491_s12, 3 }
  0xa8   : > { %s493_s17 = scalar_lea.vmem [#allocation10], %s1211_s15 }
  0xa9   : > { %1696 = dma.done.wait (%p2037_p0), %s481_s2, 128  }
  0xaa   : > { %1698 = vsyncadd (%p2037_p0), %s481_s2, 4294967168  ;;  %s499_s6 = scalar_lea.sflag [#allocation12], %s491_s12  ;;  %s502_s30 = scalar_lea.vmem [#allocation11], %s1211_s15 }
  0xab   : > { %1700 = dma.done.wait (%p2037_p0), %s499_s6, 128  }
  0xac   : > { %1702 = vsyncadd (%p2037_p0), %s499_s6, 4294967168  ;;  %v1417_v0 = vld [vmem:[%s493_s17] sm:$0xff]   ;;  %v1418_v1 = vld [vmem:[%s502_s30] sm:$0xff]   ;;  %vm622_vm0 = vcmask 130048   ;;  %s2359_s29 = sld [smem:[#allocation27_spill]]  ;;  %s555_s18 = scalar_lea.vmem [#allocation13], %s2080_s8 }
  0xad   : > { %1249 = vmatprep.subr.bf16.mxu0 %v1417_v0  ;;  %v572_v2 = vld [vmem:[%s457_s1] sm:$0xff]  ;;  %v573_v3 = vld [vmem:[%s457_s1 + $0x8] sm:$0xff]  ;;  %1255 = vmatprep.subr.bf16.mxu1 %v1418_v1  ;;  %s2360_s14 = sld [smem:[#allocation26_spill]]  ;;  %s904_s23 = sshll.u32 %s555_s18, 4  ;;  %s2186_s23 = int_to_ptr.vmem [resolvable:$true] %s904_s23 }
  0xae   : > { %v574_v4 = vld [vmem:[%s466_s5] sm:$0xff]  ;;  %1250 = vmatpush3.bf16.msra.mxu0 %v1417_v0  ;;  %v575_v5 = vld [vmem:[%s466_s5 + $0x8] sm:$0xff]  ;;  %1256 = vmatpush3.bf16.msra.mxu1 %v1418_v1  ;;  %s562_s16 = scalar_lea.vmem [#allocation14], %s2080_s8  ;;  %s2361_s19 = sld [smem:[#allocation40_spill]] }
  0xaf   : > { %v2113_v6 = vld [vmem:[%s2095_s27] sm:$0xff]  ;;  %v2116_v7 = vld [vmem:[%s2095_s27 + $0x8] sm:$0xff]  ;;  %v578_v14 = vld [vmem:[%s2095_s27 + $0x10] sm:$0xff]  ;;  %1261 = vmatprep.subr.bf16.mxu0 %v1417_v0  ;;  %1267 = vmatprep.subr.bf16.mxu1 %v1418_v1  ;;  %s882_s15 = scalar_lea.sflag [#allocation4], %s2077_s7  ;;  %s1587_s17 = scalar_lea.vmem %s2186_s23, 256 }
  0xb0   : > { %v2119_v8 = vld [vmem:[%s2097_s22] sm:$0xff]  ;;  %v2122_v9 = vld [vmem:[%s2097_s22 + $0x8] sm:$0xff]  ;;  %v584_v10 = vmul.f32 %v2113_v6, %v572_v2  ;;  %v585_v11 = vmul.f32 %v2116_v7, %v573_v3  ;;  %v600_v12 = vmul.f32 %v2113_v6, %v574_v4  ;;  %v601_v13 = vmul.f32 %v2116_v7, %v575_v5  ;;  %v2134_v19 = vld [vmem:[%s2095_s27 + $0x18] sm:$0xff]  ;;  %s924_s27 = sshll.u32 %s562_s16, 4  ;;  %p1588_p8 = scmp.ne.s32.totalorder %s2186_s23, %s1587_s17  ;;  %s2193_s27 = int_to_ptr.vmem [resolvable:$true] %s924_s27 }
  0xb1   : > { %v588_v15 = vmul.f32 %v2119_v8, %v574_v4  ;;  %v589_v16 = vmul.f32 %v2122_v9, %v575_v5  ;;  %v596_v17 = vmul.f32 %v2119_v8, %v572_v2  ;;  %v597_v18 = vmul.f32 %v2122_v9, %v573_v3  ;;  %v582_v20 = vld [vmem:[%s2097_s22 + $0x10] sm:$0xff]  ;;  %v2138_v21 = vld [vmem:[%s2097_s22 + $0x18] sm:$0xff]  ;;  %s2363_s22 = sld [smem:[#allocation41_spill]]  ;;  %s1765_s6 = smov [#allocation13]  }
  0xb2   : > { %v586_v22 = vmul.f32 %v578_v14, %v572_v2  ;;  %v587_v23 = vmul.f32 %v2134_v19, %v573_v3  ;;  %v590_v24 = vmul.f32 %v582_v20, %v574_v4  ;;  %v591_v25 = vmul.f32 %v2138_v21, %v575_v5  ;;  %s1277_s21 = smul.u32 10, %s2359_s29  ;;  %p1589_p6 = pnand %p1588_p8, %p1897_p9 }
  0xb3   : > { %v592_v26 = vsub.f32 %v584_v10, %v588_v15  ;;  %v593_v27 = vsub.f32 %v585_v11, %v589_v16  ;;  %v604_v28 = vadd.f32 %v600_v12, %v596_v17  ;;  %v605_v29 = vadd.f32 %v601_v13, %v597_v18  ;;  %s1227_s24 = sshll.u32 %s2360_s14, 1  ;;  %s1591_s30 = sshll.u32 %s1765_s6, 4  ;;  %s1592_s30 = int_to_ptr.vmem [resolvable:$false] %s1591_s30 }
  0xb4   : > { %v594_v30 = vsub.f32 %v586_v22, %v590_v24  ;;  %v595_v31 = vsub.f32 %v587_v23, %v591_v25  ;;  %v598_v32 = vmul.f32 %v582_v20, %v572_v2  ;;  %v599_v33 = vmul.f32 %v2138_v21, %v573_v3  ;;  %s2162_s4 = sadd.s32 %s1277_s21, %s1227_s24  ;;  %p1590_p0 = pneg %p1589_p6 }
  0xb5   : > { %v608_v34 = vpack.c.bf16 %v593_v27, %v592_v26  ;;  %v610_v35 = vpack.c.bf16 %v605_v29, %v604_v28  ;;  %v602_v36 = vmul.f32 %v578_v14, %v574_v4  ;;  %v603_v37 = vmul.f32 %v2134_v19, %v575_v5  ;;  %s1228_s13 = sshll.u32 %s2162_s4, 7  ;;  %s1593_s29 = scalar_lea.vmem %s1592_s30, 512 }
  0xb6   : > { %v609_v38 = vpack.c.bf16 %v595_v31, %v594_v30  ;;  %s2180_s5 = scalar_lea.hbm %s2361_s19, %s1228_s13  ;;  %p1594_p3 = scmp.lt.s32.totalorder %s2186_s23, %s1592_s30 }
  0xb7   : > { %1251 = vmatprep.mubr.msk.bf16.mxu0 %vm622_vm0, %v608_v34  ;;  %1257 = vmatprep.mubr.msk.bf16.mxu1 %vm622_vm0, %v610_v35  ;;  %v606_v39 = vadd.f32 %v602_v36, %v598_v32  ;;  %v607_v40 = vadd.f32 %v603_v37, %v599_v33  ;;  %s2191_s12 = scalar_lea.hbm %s2363_s22, %s1228_s13  ;;  %p1595_p4 = scmp.lt.s32.totalorder %s1593_s29, %s1587_s17 }
  0xb8   : > { %1252 = vmatmul.mubr.msk.bf16.vlgmr.msra.gmra.mxu0 %vm622_vm0, %v609_v38 }
  0xb9   : > { %v611_v41 = vpack.c.bf16 %v607_v40, %v606_v39  ;;  %1262 = vmatpush3.bf16.msra.mxu0 %v1417_v0  ;;  %1263 = vmatprep.mubr.msk.bf16.mxu0 %vm622_vm0, %v610_v35  ;;  %p1596_p5 = por %p1595_p4, %p1594_p3 }
  0xbb   : > { %1258 = vmatmul.mubr.msk.bf16.vlgmr.msra.gmra.mxu1 %vm622_vm0, %v611_v41  ;;  %p1597_p7 = pnand %p1596_p5, %p1590_p0 }
  0xbc   : > { %1268 = vmatpush3.bf16.msra.mxu1 %v1418_v1  ;;  %1269 = vmatprep.mubr.msk.bf16.mxu1 %vm622_vm0, %v608_v34 }
  0xc0   : > { %1264 = vmatmul.mubr.msk.bf16.vlgmr.msra.gmra.mxu0 %vm622_vm0, %v611_v41 }
  0xc3   : > { %1270 = vmatmul.mubr.msk.bf16.vlgmr.msra.gmra.mxu1 %vm622_vm0, %v609_v38 }
 0x178   : > { %v1253_v42 = vpop.f32.mrf.mxu0 }
 0x17a   : > { %v663_v43 = vpop.f32.mrf.mxu0 }
 0x17b   : > { %v1259_v44 = vpop.f32.mrf.mxu1 }
 0x17c   : > { %v1254_v45 = vpop.f32.mrf.mxu0  ;;  %v741_v50 = vsub.f32 %v1253_v42, %v1259_v44 }
 0x17d   : > { %v724_v46 = vpop.f32.mrf.mxu1 }
 0x17e   : > { %v666_v47 = vpop.f32.mrf.mxu0  ;;  %v739_v53 = vsub.f32 %v663_v43, %v724_v46  ;;  %v843_v57 = vmul.f32 %v741_v50, %v578_v14  ;;  %v867_v58 = vmul.f32 %v741_v50, %v582_v20 }
 0x17f   : > { %v1260_v48 = vpop.f32.mrf.mxu1 }
 0x180   : > { %v1265_v49 = vpop.f32.mrf.mxu0  ;;  %v742_v60 = vsub.f32 %v1254_v45, %v1260_v48  ;;  %v841_v0 = vmul.f32 %v739_v53, %v2113_v6  ;;  %v865_v1 = vmul.f32 %v739_v53, %v2119_v8 }
 0x181   : > { %v727_v51 = vpop.f32.mrf.mxu1 }
 0x182   : > { %v777_v52 = vpop.f32.mrf.mxu0  ;;  %v740_v12 = vsub.f32 %v666_v47, %v727_v51  ;;  %v868_v18 = vmul.f32 %v742_v60, %v2138_v21 }
 0x183   : > { %v1271_v54 = vpop.f32.mrf.mxu1 }
 0x184   : > { %v835_v55 = vadd.f32 %v1271_v54, %v1265_v49  ;;  %v1266_v56 = vpop.f32.mrf.mxu0  ;;  %v842_v26 = vmul.f32 %v740_v12, %v2116_v7 }
 0x185   : > { %v826_v59 = vpop.f32.mrf.mxu1 }
 0x186   : > { %v847_v61 = vmul.f32 %v835_v55, %v582_v20  ;;  %v863_v62 = vmul.f32 %v835_v55, %v578_v14  ;;  %v827_v63 = vadd.f32 %v826_v59, %v777_v52  ;;  %v780_v11 = vpop.f32.mrf.mxu0  ;;  %v844_v14 = vmul.f32 %v742_v60, %v2134_v19 }
 0x187   : > { %v1272_v2 = vpop.f32.mrf.mxu1 }
 0x188   : > { %v851_v3 = vadd.f32 %v847_v61, %v843_v57  ;;  %v871_v4 = vsub.f32 %v863_v62, %v867_v58  ;;  %v845_v5 = vmul.f32 %v827_v63, %v2119_v8  ;;  %v861_v10 = vmul.f32 %v827_v63, %v2113_v6 }
 0x189   : > { %v838_v13 = vadd.f32 %v1272_v2, %v1266_v56  ;;  %v829_v15 = vpop.f32.mrf.mxu1 }
 0x18a   : > { %v849_v16 = vadd.f32 %v845_v5, %v841_v0  ;;  %v869_v17 = vsub.f32 %v861_v10, %v865_v1  ;;  %v830_v23 = vadd.f32 %v829_v15, %v780_v11  ;;  %v854_v6 = vsel %vm622_vm0, %v851_v3, 0.0 }
 0x18b   : > { %v848_v20 = vmul.f32 %v838_v13, %v2138_v21  ;;  %v864_v22 = vmul.f32 %v838_v13, %v2134_v19  ;;  %v874_v8 = vsel %vm622_vm0, %v871_v4, 0.0  ;;  %v866_v21 = vmul.f32 %v740_v12, %v2122_v9 }
 0x18c   : > { %v853_v24 = vsel %vm622_vm0, %v849_v16, 0.0  ;;  %v873_v25 = vsel %vm622_vm0, %v869_v17, 0.0  ;;  %v846_v30 = vmul.f32 %v830_v23, %v2122_v9  ;;  %v862_v31 = vmul.f32 %v830_v23, %v2116_v7 }
 0x18d   : > { %v855_v27 = vadd.f32 %v854_v6, %v853_v24  ;;  %v875_v19 = vadd.f32 %v874_v8, %v873_v25  ;;  %v852_v28 = vadd.f32 %v848_v20, %v844_v14  ;;  %v872_v29 = vsub.f32 %v864_v22, %v868_v18 }
 0x18e   : > { %v850_v32 = vadd.f32 %v846_v30, %v842_v26  ;;  %v870_v33 = vsub.f32 %v862_v31, %v866_v21 }
 0x18f   : > { %859 = vst.msk [vmem:[%s555_s18] sm:$0xff] %vm622_vm0, %v855_v27  ;;  %879 = vst.msk [vmem:[%s562_s16] sm:$0xff] %vm622_vm0, %v875_v19  ;;  %v857_v7 = vsel %vm622_vm0, %v852_v28, 0.0  ;;  %v877_v9 = vsel %vm622_vm0, %v872_v29, 0.0 }
 0x190   : > { %v856_v34 = vsel %vm622_vm0, %v850_v32, 0.0  ;;  %v876_v35 = vsel %vm622_vm0, %v870_v33, 0.0 }
 0x191   : > { %v858_v36 = vadd.f32 %v857_v7, %v856_v34  ;;  %v878_v37 = vadd.f32 %v877_v9, %v876_v35 }
 0x193   : > { %860 = vst.msk [vmem:[%s555_s18 + $0x8] sm:$0xff] %vm622_vm0, %v858_v36  ;;  %880 = vst.msk [vmem:[%s562_s16 + $0x8] sm:$0xff] %vm622_vm0, %v878_v37 }
 0x194   : > { %1600 = shalt.err (!%p1597_p7)
}
 0x195   : > { %s1601_s14 = scalar_lea.hbm %s2180_s5, 256  ;;  %s1605_s4 = scalar_lea.hbm %s2361_s19, 2560 }
 0x196   : > { %p1602_p10 = scmp.ne.s32.totalorder %s2180_s5, %s1601_s14  ;;  %p1606_p11 = scmp.lt.s32.totalorder %s2180_s5, %s2361_s19 }
 0x197   : > { %p1607_p1 = scmp.lt.s32.totalorder %s1605_s4, %s1601_s14 }
 0x198   : > { %p1603_p2 = pnand %p1602_p10, %p1897_p9 }
 0x199   : > { %p1608_p8 = por %p1607_p1, %p1606_p11 }
 0x19a   : > { %p1604_p12 = pneg %p1603_p2 }
 0x19c   : > { %p1609_p6 = pnand %p1608_p8, %p1604_p12 }
 0x19e   : > { %1612 = shalt.err (!%p1609_p6)
}
 0x19f   : > { %s1766_s16 = smov 128   ;;  %s1767_s1 = smov 8  }
 0x1a0   : > { %1291 = dma.vmem_to_hbm [thread:$0]  (%p1897_p9), %s2186_s23, 256, %s2180_s5, %s882_s15, %s1766_s16, %s1766_s16, %s1767_s1  }
 0x1a1   : > { %s887_s9 = scalar_lea.sflag [#allocation15], %s2077_s7  ;;  %s1613_s8 = scalar_lea.vmem %s2193_s27, 256 }
 0x1a2   : > { %p1614_p0 = scmp.ne.s32.totalorder %s2193_s27, %s1613_s8  ;;  %s1768_s2 = smov [#allocation14]  }
 0x1a3   : > { %s1617_s17 = sshll.u32 %s1768_s2, 4  ;;  %s1618_s17 = int_to_ptr.vmem [resolvable:$false] %s1617_s17 }
 0x1a4   : > { %p1615_p3 = pnand %p1614_p0, %p1897_p9  ;;  %s1619_s6 = scalar_lea.vmem %s1618_s17, 512 }
 0x1a5   : > { %p1620_p5 = scmp.lt.s32.totalorder %s2193_s27, %s1618_s17  ;;  %p1621_p7 = scmp.lt.s32.totalorder %s1619_s6, %s1613_s8 }
 0x1a6   : > { %p1616_p4 = pneg %p1615_p3 }
 0x1a7   : > { %p1622_p10 = por %p1621_p7, %p1620_p5 }
 0x1a9   : > { %p1623_p2 = pnand %p1622_p10, %p1616_p4 }
 0x1ab   : > { %1626 = shalt.err (!%p1623_p2)
}
 0x1ac   : > { %s1627_s23 = scalar_lea.hbm %s2191_s12, 256  ;;  %s1631_s15 = scalar_lea.hbm %s2363_s22, 2560 }
 0x1ad   : > { %p1628_p12 = scmp.ne.s32.totalorder %s2191_s12, %s1627_s23  ;;  %p1632_p8 = scmp.lt.s32.totalorder %s2191_s12, %s2363_s22 }
 0x1ae   : > { %p1633_p6 = scmp.lt.s32.totalorder %s1631_s15, %s1627_s23 }
 0x1af   : > { %p1629_p11 = pnand %p1628_p12, %p1897_p9 }
 0x1b0   : > { %p1634_p0 = por %p1633_p6, %p1632_p8 }
 0x1b1   : > { %p1630_p1 = pneg %p1629_p11 }
 0x1b3   : > { %p1635_p3 = pnand %p1634_p0, %p1630_p1 }
 0x1b5   : > { %1638 = shalt.err (!%p1635_p3)
}
 0x1b6   : > { %1292 = dma.vmem_to_hbm [thread:$0]  (%p1897_p9), %s2193_s27, 256, %s2191_s12, %s887_s9, %s1766_s16, %s1766_s16, %s1767_s1  }
 0x1b7 PF: > { %s2364_s14 = sld [smem:[#allocation23_spill]]  ;;  %p1322_p4 = scmp.ge.s32.totalorder %s1753_s11, 2 }
 0x1b9   : > { %p1315_p5 = pnand %p1322_p4, %p1907_p13 }
 0x1bb   : > { %p1316_p7 = pneg %p1315_p5 }
 0x1bd   : > { %s939_s24 = sand.u32 1, %s2364_s14  }
 0x1be   : > { %s940_s4 = scalar_lea.sflag [#allocation4], %s939_s24 }
 0x1bf   : > { %1704 = dma.done.wait (%p1316_p7), %s940_s4, 256  }
 0x1c0   : > { %1706 = vsyncadd (%p1316_p7), %s940_s4, 4294967040  ;;  %s949_s13 = scalar_lea.sflag [#allocation15], %s939_s24 }
 0x1c1   : > { %1708 = dma.done.wait (%p1316_p7), %s949_s13, 256  }
 0x1c2   : > { %1710 = vsyncadd (%p1316_p7), %s949_s13, 4294967040  ;;  %s36_s11 = sadd.s32 1, %s1753_s11   ;;  %s2366_s27 = sld [smem:[#allocation24_spill]] }
 0x1c3   : > { %p33_p10 = scmp.ge.s32.totalorder %s36_s11, 12   ;;  %s2367_s28 = sld [smem:[#allocation25_spill]] }
 0x1c4   : > { %s2368_s29 = sld [smem:[#allocation34_spill]]  ;;  %s2372_s24 = smov %s1717_s25 }
 0x1c5   : > { %s2369_s30 = sld [smem:[#allocation28_spill]]  ;;  %s2373_s25 = smov %s1721_s26 }
 0x1c6   : > { %s2370_s9 = sld [smem:[#allocation29_spill]]  ;;  %s2374_s26 = smov %s2027_s20 }
 0x1c7   : > { %s2371_s12 = sld [smem:[#allocation30_spill]]  ;;  %s2375_s8 = smov %s1749_s10 }
 0x1c9   :  { %35 = sbr.rel (!%p33_p10) target bundleno = 24 (0x18), region = 167 }
 0x1cd   : > { %s2376_s10 = smov %s2371_s12 }
 0x1ce   :  { %954 = vsyncpa [#allocation3], 1 }
 0x1cf   :  { %956 = vsyncpa [#allocation3 + $0x1], 1 }
 0x1d0   :  { %957 = vsyncpa [#allocation6], 1 }
 0x1d1   :  { %959 = vsyncpa [#allocation6 + $0x1], 1 }
 0x1d2   :  { %960 = vsyncpa [#allocation9], 1 }
 0x1d3   :  { %962 = vsyncpa [#allocation9 + $0x1], 1 }
 0x1d4   :  { %963 = vsyncpa [#allocation12], 1 }
 0x1d5   :  { %965 = vsyncpa [#allocation12 + $0x1], 1 }
 0x1d6   :  { %966 = vsyncpa [#allocation4], 1 }
 0x1d7   :  { %968 = vsyncpa [#allocation4 + $0x1], 1 }
 0x1d8   :  { %969 = vsyncpa [#allocation15], 1 }
 0x1d9   :  { %971 = vsyncpa [#allocation15 + $0x1], 1 }

</bundles_post_ra>
